<compile_context>
chip_gen: v6e
topology: v6e:2x2x1
jax: 0.10.0
libtpu: 0.0.40
codegen_flags: <defaults>
</compile_context>

<pallas_src>
import functools

import jax
import jax.numpy as jnp
from jax.experimental import pallas as pl
from jax.experimental.pallas import tpu as pltpu

HIDDEN = 64
WIDTH = 2 * HIDDEN  # 128 fused lanes: [actor hidden | critic hidden]


def _round_up(x, m):
    return (x + m - 1) // m * m


# --------------------------------------------------------------------------- #
# Kernel
# --------------------------------------------------------------------------- #
def fused_policy_kernel(x_ref, w_ref, b_ref, out_ref, *, s_pad, num_actions, out_w):
    x = x_ref[...]                                      # (TILE_B, s_pad) f32

    # Static slices of the packed weight slab (all row offsets are multiples of 8).
    w1 = w_ref[0:s_pad, :]                              # (s_pad, 128) = [aw1 | cw1]
    w2 = w_ref[s_pad:s_pad + WIDTH, :]                  # (128, 128) block-diag(aw2, cw2)
    w3 = w_ref[s_pad + WIDTH:s_pad + 2 * WIDTH, :]      # (128, 128) block-diag(aw3, cw3)+pad
    b1 = b_ref[0:1, :]                                  # (1, 128)
    b2 = b_ref[1:2, :]
    b3 = b_ref[2:3, :]

    # Fused actor|critic MLP — every activation is exactly 128 lanes wide.
    h = jnp.tanh(jnp.dot(x, w1, preferred_element_type=jnp.float32) + b1)
    h = jnp.tanh(jnp.dot(h, w2, preferred_element_type=jnp.float32) + b2)
    z = jnp.dot(h, w3, preferred_element_type=jnp.float32) + b3    # (TILE_B, 128)
    # lanes [0,A): actor logits; lane A: critic value; lanes > A: zeros (zero weights)

    # Narrow to the useful lanes before the cheap softmax math + store.
    z_n = z[:, 0:out_w]                                 # (TILE_B, out_w)

    lane = jax.lax.broadcasted_iota(jnp.int32, (1, out_w), 1)
    is_logit = lane < num_actions
    is_value = lane == num_actions

    # Masked, numerically-stable softmax over the action lanes only.
    logits = jnp.where(is_logit, z_n, jnp.float32(-1e30))
    m = jnp.max(logits, axis=-1, keepdims=True)
    e = jnp.where(is_logit, jnp.exp(logits - m), 0.0)
    denom = jnp.sum(e, axis=-1, keepdims=True)
    prob = e / denom                                    # exact: probs sum to 1 in f32

    # Narrow f32 store: [probs | value | zeros] — 16x less HBM writeback than (B,128).
    out_ref[...] = jnp.where(is_logit, prob, jnp.where(is_value, z_n, 0.0))


# --------------------------------------------------------------------------- #
# Host-side packing (once per parameter update) + wrapper
# --------------------------------------------------------------------------- #
def pack_params(params, state_dim):
    """Pack the 12 per-layer tensors into one weight slab + one bias slab.

    Call once per parameter update and reuse the result across forward calls.
    """
    s_pad = _round_up(max(state_dim, 8), 8)
    A = params["aw3"].shape[1]
    assert A + 1 <= WIDTH, "num_actions + 1 must fit in the 128 fused lanes"
    out_w = _round_up(A + 1, 8)                         # narrow output width

    w1 = jnp.zeros((s_pad, WIDTH), jnp.float32)
    w1 = w1.at[:state_dim, :HIDDEN].set(params["aw1"])
    w1 = w1.at[:state_dim, HIDDEN:].set(params["cw1"])

    w2 = jnp.zeros((WIDTH, WIDTH), jnp.float32)
    w2 = w2.at[:HIDDEN, :HIDDEN].set(params["aw2"])
    w2 = w2.at[HIDDEN:, HIDDEN:].set(params["cw2"])

    w3 = jnp.zeros((WIDTH, WIDTH), jnp.float32)
    w3 = w3.at[:HIDDEN, :A].set(params["aw3"])
    w3 = w3.at[HIDDEN:, A:A + 1].set(params["cw3"])

    w_slab = jnp.concatenate([w1, w2, w3], axis=0)      # (s_pad + 256, 128)

    b = jnp.zeros((8, WIDTH), jnp.float32)              # 8 rows for sublane alignment
    b = b.at[0, :HIDDEN].set(params["ab1"][0])
    b = b.at[0, HIDDEN:].set(params["cb1"][0])
    b = b.at[1, :HIDDEN].set(params["ab2"][0])
    b = b.at[1, HIDDEN:].set(params["cb2"][0])
    b = b.at[2, :A].set(params["ab3"][0])
    b = b.at[2, A].set(params["cb3"][0, 0])

    meta = dict(state_dim=state_dim, s_pad=s_pad, num_actions=A, out_w=out_w)
    return w_slab, b, meta


def _pick_tile_b(batch):
    if batch <= 512:
        return _round_up(batch, 8)                      # single step for act()-sized batches
    # >=2 grid steps (keeps both v7x TensorCores busy via the "parallel" batch axis),
    # tiles capped at 2048 rows so the double-buffered working set stays far below
    # every generation's VMEM while amortizing the ~0.35us per-step overhead.
    return min(2048, _round_up((batch + 1) // 2, 8))


def policy_forward(state, packed, tile_b=None):
    """state: (B, S) f32; packed = pack_params(...). Returns (probs (B,A), value (B,1))."""
    w_slab, b_slab, meta = packed
    B, S = state.shape
    assert S == meta["state_dim"]
    s_pad, A, out_w = meta["s_pad"], meta["num_actions"], meta["out_w"]

    if tile_b is None:
        tile_b = _pick_tile_b(B)
    tile_b = _round_up(tile_b, 8)
    grid = pl.cdiv(B, tile_b)                           # OOB batch tail handled by Pallas

    # No batch-pad copy. Feature pad only if state_dim is not a multiple of 8.
    x = state if S == s_pad else jnp.pad(state, ((0, 0), (0, s_pad - S)))

    kernel = functools.partial(
        fused_policy_kernel, s_pad=s_pad, num_actions=A, out_w=out_w)

    out = pl.pallas_call(
        kernel,
        out_shape=jax.ShapeDtypeStruct((B, out_w), jnp.float32),
        grid_spec=pltpu.PrefetchScalarGridSpec(
            num_scalar_prefetch=0,
            grid=(grid,),
            in_specs=[
                pl.BlockSpec((tile_b, s_pad), lambda i: (i, 0)),              # states (tiled)
                pl.BlockSpec((s_pad + 2 * WIDTH, WIDTH), lambda i: (0, 0)),   # weight slab (resident)
                pl.BlockSpec((8, WIDTH), lambda i: (0, 0)),                   # bias slab (resident)
            ],
            out_specs=pl.BlockSpec((tile_b, out_w), lambda i: (i, 0)),        # narrow combined out
        ),
        compiler_params=pltpu.CompilerParams(
            dimension_semantics=("parallel",),          # batch steps shard across v7x's 2 TCs
            vmem_limit_bytes=48 * 1024 * 1024,          # lifts v5e's 16MiB default, < v7x's 64MiB
        ),
    )(x, w_slab, b_slab)

    prob = out[:, :A]
    value = out[:, A:A + 1]
    return prob, value


# --------------------------------------------------------------------------- #
# Parameter init + pure-JAX reference
# --------------------------------------------------------------------------- #
def init_linear(key, fan_in, fan_out):
    """PyTorch-style uniform(-1/sqrt(fan_in), 1/sqrt(fan_in)); weight stored (in, out)."""
    kw, kb = jax.random.split(key)
    bound = 1.0 / jnp.sqrt(jnp.float32(fan_in))
    w = jax.random.uniform(kw, (fan_in, fan_out), jnp.float32, -bound, bound)
    b = jax.random.uniform(kb, (1, fan_out), jnp.float32, -bound, bound)
    return w, b


def make_params(key, state_dim, num_actions, hidden=HIDDEN):
    ks = jax.random.split(key, 6)
    aw1, ab1 = init_linear(ks[0], state_dim, hidden)
    aw2, ab2 = init_linear(ks[1], hidden, hidden)
    aw3, ab3 = init_linear(ks[2], hidden, num_actions)
    cw1, cb1 = init_linear(ks[3], state_dim, hidden)
    cw2, cb2 = init_linear(ks[4], hidden, hidden)
    cw3, cb3 = init_linear(ks[5], hidden, 1)
    return dict(aw1=aw1, ab1=ab1, aw2=aw2, ab2=ab2, aw3=aw3, ab3=ab3,
                cw1=cw1, cb1=cb1, cw2=cw2, cb2=cb2, cw3=cw3, cb3=cb3)


def policy_forward_ref(state, p):
    h = jnp.tanh(state @ p["aw1"] + p["ab1"])
    h = jnp.tanh(h @ p["aw2"] + p["ab2"])
    prob = jax.nn.softmax(h @ p["aw3"] + p["ab3"], axis=-1)
    c = jnp.tanh(state @ p["cw1"] + p["cb1"])
    c = jnp.tanh(c @ p["cw2"] + p["cb2"])
    value = c @ p["cw3"] + p["cb3"]
    return prob, value


# TODO(synk): Categorical sampling / log_prob / entropy from act()/evaluate() are
# cheap host-side distribution bookkeeping and are intentionally left outside the kernel.

if __name__ == "__main__":
    # Small shapes consistent with the module: args.state_dim=8, args.num_actions=4
    BATCH, STATE_DIM, NUM_ACTIONS = 8, 8, 4

    key = jax.random.PRNGKey(0)
    k_params, k_state, k_big = jax.random.split(key, 3)
    params = make_params(k_params, STATE_DIM, NUM_ACTIONS)
    state = jax.random.normal(k_state, (BATCH, STATE_DIM), jnp.float32)

    # Pack once (per parameter update), reuse across forward calls.
    packed = pack_params(params, STATE_DIM)

    prob, value = policy_forward(state, packed)
    jax.block_until_ready((prob, value))

    prob_ref, value_ref = policy_forward_ref(state, params)
    assert prob.shape == (BATCH, NUM_ACTIONS)
    assert value.shape == (BATCH, 1)
    assert jnp.allclose(prob, prob_ref, atol=1e-3, rtol=1e-3)
    assert jnp.allclose(value, value_ref, atol=1e-4, rtol=1e-4)
    assert jnp.allclose(jnp.sum(prob, axis=-1), 1.0, atol=1e-3)

    # Exercise the tiled path: grid=2 with an out-of-bounds batch tail (1000 -> 2 x 504).
    big_state = jax.random.normal(k_big, (1000, STATE_DIM), jnp.float32)
    big_prob, big_value = policy_forward(big_state, packed)
    jax.block_until_ready((big_prob, big_value))
    big_prob_ref, big_value_ref = policy_forward_ref(big_state, params)
    assert big_prob.shape == (1000, NUM_ACTIONS)
    assert big_value.shape == (1000, 1)
    assert jnp.allclose(big_prob, big_prob_ref, atol=1e-3, rtol=1e-3)
    assert jnp.allclose(big_value, big_value_ref, atol=1e-4, rtol=1e-4)
    assert jnp.allclose(jnp.sum(big_prob, axis=-1), 1.0, atol=1e-3)

    print("KERNEL_OK")
</pallas_src>

<mosaic_0001>
module attributes {stable_mosaic.version = 11 : i64} {
  func.func @fused_policy_kernel(%arg0: i32, %arg1: memref<8x8xf32, #tpu.memory_space<vmem>>, %arg2: memref<264x128xf32, #tpu.memory_space<vmem>>, %arg3: memref<8x128xf32, #tpu.memory_space<vmem>>, %arg4: memref<8x8xf32, #tpu.memory_space<vmem>>) attributes {dimension_semantics = [#tpu.dimension_semantics<parallel>], iteration_bounds = array<i64: 1>, scalar_prefetch = 0 : i64, scratch_operands = 0 : i64, tpu.core_type = #tpu.core_type<tc>, window_params = [{transform_indices = @transform_0, window_bounds = array<i64: 8, 8>}, {pipeline_mode = #tpu.pipeline_mode<synchronous>, transform_indices = @transform_1, window_bounds = array<i64: 264, 128>}, {pipeline_mode = #tpu.pipeline_mode<synchronous>, transform_indices = @transform_2, window_bounds = array<i64: 8, 128>}, {transform_indices = @transform_3, window_bounds = array<i64: 8, 8>}]} {
    %c0 = arith.constant 0 : index
    %c0_0 = arith.constant 0 : index
    %0 = vector.load %arg1[%c0, %c0_0] : memref<8x8xf32, #tpu.memory_space<vmem>>, vector<8x8xf32>
    %c0_1 = arith.constant 0 : index
    %c0_2 = arith.constant 0 : index
    %1 = vector.load %arg2[%c0_1, %c0_2] : memref<264x128xf32, #tpu.memory_space<vmem>>, vector<8x128xf32>
    %c8 = arith.constant 8 : index
    %c0_3 = arith.constant 0 : index
    %2 = vector.load %arg2[%c8, %c0_3] : memref<264x128xf32, #tpu.memory_space<vmem>>, vector<128x128xf32>
    %c136 = arith.constant 136 : index
    %c0_4 = arith.constant 0 : index
    %3 = vector.load %arg2[%c136, %c0_4] : memref<264x128xf32, #tpu.memory_space<vmem>>, vector<128x128xf32>
    %c0_5 = arith.constant 0 : index
    %c0_6 = arith.constant 0 : index
    %4 = vector.load %arg3[%c0_5, %c0_6] : memref<8x128xf32, #tpu.memory_space<vmem>>, vector<1x128xf32>
    %c1 = arith.constant 1 : index
    %c0_7 = arith.constant 0 : index
    %5 = vector.load %arg3[%c1, %c0_7] : memref<8x128xf32, #tpu.memory_space<vmem>>, vector<1x128xf32>
    %c2 = arith.constant 2 : index
    %c0_8 = arith.constant 0 : index
    %6 = vector.load %arg3[%c2, %c0_8] : memref<8x128xf32, #tpu.memory_space<vmem>>, vector<1x128xf32>
    %cst = arith.constant dense<0.000000e+00> : vector<8x128xf32>
    %7 = tpu.matmul %0, %1, %cst {dimension_numbers = #tpu.dot_dimension_numbers<[1], [0], [0], [1], [0, 0, 1, 1], [], []>} : vector<8x8xf32>, vector<8x128xf32>, vector<8x128xf32> -> vector<8x128xf32>
    %8 = vector.broadcast %4 : vector<1x128xf32> to vector<8x128xf32>
    %9 = arith.addf %7, %8 : vector<8x128xf32>
    %10 = math.tanh %9 : vector<8x128xf32>
    %cst_9 = arith.constant dense<0.000000e+00> : vector<8x128xf32>
    %11 = tpu.matmul %10, %2, %cst_9 {dimension_numbers = #tpu.dot_dimension_numbers<[1], [0], [0], [1], [0, 0, 1, 1], [], []>} : vector<8x128xf32>, vector<128x128xf32>, vector<8x128xf32> -> vector<8x128xf32>
    %12 = vector.broadcast %5 : vector<1x128xf32> to vector<8x128xf32>
    %13 = arith.addf %11, %12 : vector<8x128xf32>
    %14 = math.tanh %13 : vector<8x128xf32>
    %cst_10 = arith.constant dense<0.000000e+00> : vector<8x128xf32>
    %15 = tpu.matmul %14, %3, %cst_10 {dimension_numbers = #tpu.dot_dimension_numbers<[1], [0], [0], [1], [0, 0, 1, 1], [], []>} : vector<8x128xf32>, vector<128x128xf32>, vector<8x128xf32> -> vector<8x128xf32>
    %16 = vector.broadcast %6 : vector<1x128xf32> to vector<8x128xf32>
    %17 = arith.addf %15, %16 : vector<8x128xf32>
    %18 = vector.extract_strided_slice %17 {offsets = [0, 0], sizes = [8, 8], strides = [1, 1]} : vector<8x128xf32> to vector<8x8xf32>
    %19 = tpu.iota {dimensions = array<i32: 1>} : vector<1x8xi32>
    %c4_i32 = arith.constant 4 : i32
    %20 = vector.broadcast %c4_i32 : i32 to vector<1x8xi32>
    %21 = arith.cmpi slt, %19, %20 : vector<1x8xi32>
    %c4_i32_11 = arith.constant 4 : i32
    %22 = vector.broadcast %c4_i32_11 : i32 to vector<1x8xi32>
    %23 = arith.cmpi eq, %19, %22 : vector<1x8xi32>
    %cst_12 = arith.constant -1.000000e+30 : f32
    %24 = vector.shape_cast %21 : vector<1x8xi1> to vector<1x8xi1>
    %25 = vector.broadcast %24 : vector<1x8xi1> to vector<8x8xi1>
    %26 = vector.broadcast %cst_12 : f32 to vector<8x8xf32>
    %27 = arith.select %25, %18, %26 : vector<8x8xi1>, vector<8x8xf32>
    %cst_13 = arith.constant dense<0xFF800000> : vector<8xf32>
    %28 = vector.multi_reduction <maximumf>, %27, %cst_13 [1] : vector<8x8xf32> to vector<8xf32>
    %29 = vector.shape_cast %28 : vector<8xf32> to vector<8x1xf32>
    %30 = vector.broadcast %29 : vector<8x1xf32> to vector<8x8xf32>
    %31 = arith.subf %27, %30 : vector<8x8xf32>
    %32 = math.exp %31 : vector<8x8xf32>
    %cst_14 = arith.constant 0.000000e+00 : f32
    %33 = vector.shape_cast %21 : vector<1x8xi1> to vector<1x8xi1>
    %34 = vector.broadcast %33 : vector<1x8xi1> to vector<8x8xi1>
    %35 = vector.broadcast %cst_14 : f32 to vector<8x8xf32>
    %36 = arith.select %34, %32, %35 : vector<8x8xi1>, vector<8x8xf32>
    %cst_15 = arith.constant dense<0.000000e+00> : vector<8xf32>
    %37 = vector.multi_reduction <add>, %36, %cst_15 [1] : vector<8x8xf32> to vector<8xf32>
    %38 = vector.shape_cast %37 : vector<8xf32> to vector<8x1xf32>
    %39 = vector.broadcast %38 : vector<8x1xf32> to vector<8x8xf32>
    %40 = arith.divf %36, %39 : vector<8x8xf32>
    %cst_16 = arith.constant 0.000000e+00 : f32
    %41 = vector.shape_cast %23 : vector<1x8xi1> to vector<1x8xi1>
    %42 = vector.broadcast %41 : vector<1x8xi1> to vector<8x8xi1>
    %43 = vector.broadcast %cst_16 : f32 to vector<8x8xf32>
    %44 = arith.select %42, %18, %43 : vector<8x8xi1>, vector<8x8xf32>
    %45 = vector.shape_cast %21 : vector<1x8xi1> to vector<1x8xi1>
    %46 = vector.broadcast %45 : vector<1x8xi1> to vector<8x8xi1>
    %47 = arith.select %46, %40, %44 : vector<8x8xi1>, vector<8x8xf32>
    %c0_17 = arith.constant 0 : index
    %c0_18 = arith.constant 0 : index
    %48 = vector.load %arg4[%c0_17, %c0_18] : memref<8x8xf32, #tpu.memory_space<vmem>>, vector<8x8xf32>
    tpu.vector_store %arg4[%c0_17, %c0_18], %47 {strides = array<i32>} : memref<8x8xf32, #tpu.memory_space<vmem>>, vector<8x8xf32>,
    return
  }
  func.func @transform_0(%arg0: i32) -> (i32, i32) {
    %c0_i32 = arith.constant 0 : i32
    %c0_i32_0 = arith.constant 0 : i32
    return %arg0, %c0_i32 : i32, i32
  }
  func.func @transform_1(%arg0: i32) -> (i32, i32) {
    %c0_i32 = arith.constant 0 : i32
    %c0_i32_0 = arith.constant 0 : i32
    %c0_i32_1 = arith.constant 0 : i32
    return %c0_i32, %c0_i32_0 : i32, i32
  }
  func.func @transform_2(%arg0: i32) -> (i32, i32) {
    %c0_i32 = arith.constant 0 : i32
    %c0_i32_0 = arith.constant 0 : i32
    %c0_i32_1 = arith.constant 0 : i32
    return %c0_i32, %c0_i32_0 : i32, i32
  }
  func.func @transform_3(%arg0: i32) -> (i32, i32) {
    %c0_i32 = arith.constant 0 : i32
    %c0_i32_0 = arith.constant 0 : i32
    return %arg0, %c0_i32 : i32, i32
  }
}

</mosaic_0001>

<bundles_post_ra>
// kernel: tpu_custom_call.1
= control target key start
LH: loop header
LB: loop body
LE: loop exit
PB: predicated region body
PF: predicated region fallthrough
CT: control target
= control target key end

     0   :  { %8 = vsyncpa [#allocation3], 0  ;;  %s660_s0 = inlined_call_operand.hbm [shape: f32[8,8], index: 0, kind: input, shape index: {}]   ;;  %s661_s1 = inlined_call_operand.hbm [shape: f32[264,128], index: 1, kind: input, shape index: {}]   ;;  %s662_s2 = inlined_call_operand.hbm [shape: f32[8,128], index: 2, kind: input, shape index: {}]   ;;  %s663_s3 = inlined_call_operand.hbm [shape: f32[8,8], index: 3, kind: output, shape index: {}]  }
   0x1   :  { %9 = vsyncpa [#allocation6], 0 }
   0x2   :  { %10 = vsyncpa [#allocation4], 0  ;;  %s574_s12 = smov [#allocation5]  }
   0x3   :  { %s26_s13 = sshll.u32 %s574_s12, 4  ;;  %s27_s13 = int_to_ptr.vmem [resolvable:$true] %s26_s13 }
   0x4   :  { %s496_s14 = scalar_lea.vmem %s27_s13, 4224  ;;  %p501_p1 = scmp.lt.s32.totalorder %s27_s13, %s27_s13 }
   0x5   :  { %p497_p0 = scmp.ne.s32.totalorder %s27_s13, %s496_s14  ;;  %p502_p2 = scmp.lt.s32.totalorder %s496_s14, %s496_s14 }
   0x7   :  { %p503_p3 = por %p502_p2, %p501_p1 }
   0x9   :  { %p504_p4 = pnand %p503_p3, %p497_p0 }
   0xb   :  { %507 = shalt.err (!%p504_p4)
}
   0xc   :  { %s575_s15 = smov 128   ;;  %s576_s16 = smov 8  }
   0xd   :  { %32 = dma.hbm_to_vmem [thread:$0]  %s661_s1, 4224, %s27_s13, [#allocation6], %s575_s15, %s575_s15, %s576_s16  }
   0xe   :  { %s577_s19 = smov [#allocation2]   ;;  %s578_s21 = smov [#allocation7]  }
   0xf   :  { %s17_s20 = sshll.u32 %s577_s19, 4  ;;  %s39_s22 = sshll.u32 %s578_s21, 4  ;;  %s18_s20 = int_to_ptr.vmem [resolvable:$true] %s17_s20  ;;  %s40_s22 = int_to_ptr.vmem [resolvable:$true] %s39_s22 }
  0x10   :  { %s516_s23 = scalar_lea.vmem %s18_s20, 128  ;;  %p521_p6 = scmp.lt.s32.totalorder %s18_s20, %s18_s20 }
  0x11   :  { %p517_p5 = scmp.ne.s32.totalorder %s18_s20, %s516_s23  ;;  %p522_p7 = scmp.lt.s32.totalorder %s516_s23, %s516_s23 }
  0x13   :  { %p523_p8 = por %p522_p7, %p521_p6 }
  0x15   :  { %p524_p9 = pnand %p523_p8, %p517_p5 }
  0x17   :  { %527 = shalt.err (!%p524_p9)
}
  0x18   :  { %20 = dma.hbm_to_vmem [thread:$0]  %s660_s0, 128, %s18_s20, [#allocation3]  }
  0x19   :  { %s536_s26 = scalar_lea.vmem %s40_s22, 128  ;;  %p541_p11 = scmp.lt.s32.totalorder %s40_s22, %s40_s22 }
  0x1a   :  { %p537_p10 = scmp.ne.s32.totalorder %s40_s22, %s536_s26  ;;  %p542_p12 = scmp.lt.s32.totalorder %s536_s26, %s536_s26 }
  0x1c   :  { %p543_p13 = por %p542_p12, %p541_p11 }
  0x1e   :  { %p544_p0 = pnand %p543_p13, %p537_p10 }
  0x20   :  { %547 = shalt.err (!%p544_p0)
}
  0x21   :  { %42 = dma.hbm_to_vmem [thread:$0]  %s662_s2, 128, %s40_s22, [#allocation6]  }
  0x22   :  { %568 = dma.done.wait [#allocation3], 128  }
  0x23   :  { %569 = vsyncadd [#allocation3], 4294967168 }
  0x24   :  { %570 = dma.done.wait [#allocation6], 4352  }
  0x25   :  { %571 = vsyncadd [#allocation6], 4294962944  ;;  %v579_v0 = vmov 0.0   ;;  %vm580_vm0 = vmmov 0   ;;  %vm93_vm1 = vcmask 64512   ;;  %v53_v1 = vld [vmem:[#allocation5] sm:$0xff]  ;;  %v317_v45 = vlaneseq }
  0x26   :  { %397 = vmatprep.subr.mxu0 %v579_v0  ;;  %399 = vmatprep.mubr.msk.f32.mxu0 %vm580_vm0, %v579_v0  ;;  %v52_v2 = vld [vmem:[#allocation2] sm:$0xff]  ;;  %v69_v3 = vld [vmem:[#allocation5 + $0x80] sm:$0xff]  ;;  %v67_v5 = vld [vmem:[#allocation5 + $0x70] sm:$0xff]  ;;  %s581_s0 = smov [#allocation8]  }
  0x27   :  { %402 = vmatprep.subr.mxu1 %v579_v0  ;;  %434 = vmatprep.mubr.msk.f32.mxu1 %vm580_vm0, %v579_v0  ;;  %v68_v4 = vld [vmem:[#allocation5 + $0x78] sm:$0xff]  ;;  %v66_v6 = vld [vmem:[#allocation5 + $0x68] sm:$0xff]  ;;  %v65_v7 = vld [vmem:[#allocation5 + $0x60] sm:$0xff]  ;;  %v318_v46 = vand.u32 127, %v317_v45  ;;  %s347_s2 = sshll.u32 %s581_s0, 4  ;;  %s348_s2 = int_to_ptr.vmem [resolvable:$true] %s347_s2 }
  0x28   :  { %398 = vmatpush3.msra.mxu0 %v53_v1  ;;  %403 = vmatpush3.msra.mxu1 %v69_v3  ;;  %v64_v8 = vld [vmem:[#allocation5 + $0x58] sm:$0xff]  ;;  %v63_v9 = vld [vmem:[#allocation5 + $0x50] sm:$0xff]  ;;  %v62_v10 = vld [vmem:[#allocation5 + $0x48] sm:$0xff]  ;;  %s548_s28 = scalar_lea.vmem %s348_s2, 128  ;;  %p553_p2 = scmp.lt.s32.totalorder %s348_s2, %s348_s2 }
  0x29   :  { %400 = vmatmul.mubr.msk.f32.vlgmr.msra.gmra.mxu0 %vm93_vm1, %v52_v2  ;;  %404 = vmatprep.subr.mxu1 %v579_v0  ;;  %v61_v11 = vld [vmem:[#allocation5 + $0x40] sm:$0xff]  ;;  %v60_v12 = vld [vmem:[#allocation5 + $0x38] sm:$0xff]  ;;  %v59_v13 = vld [vmem:[#allocation5 + $0x30] sm:$0xff]  ;;  %vm320_vm2 = vcmp.eq.s32.totalorder %v318_v46, 4  ;;  %vm319_vm3 = vcmp.lt.s32.totalorder %v318_v46, 4  ;;  %p549_p1 = scmp.ne.s32.totalorder %s348_s2, %s548_s28  ;;  %p554_p3 = scmp.lt.s32.totalorder %s548_s28, %s548_s28 }
  0x2a   :  { %405 = vmatpush3.msra.mxu1 %v68_v4  ;;  %437 = vmatprep.subr.mxu0 %v579_v0  ;;  %v58_v14 = vld [vmem:[#allocation5 + $0x28] sm:$0xff]  ;;  %v57_v15 = vld [vmem:[#allocation5 + $0x20] sm:$0xff]  ;;  %v56_v16 = vld [vmem:[#allocation5 + $0x18] sm:$0xff] }
  0x2b   :  { %406 = vmatprep.subr.mxu1 %v579_v0  ;;  %469 = vmatprep.mubr.msk.f32.mxu0 %vm580_vm0, %v579_v0  ;;  %v55_v17 = vld [vmem:[#allocation5 + $0x10] sm:$0xff]  ;;  %v54_v18 = vld [vmem:[#allocation5 + $0x8] sm:$0xff]  ;;  %v85_v19 = vld [vmem:[#allocation5 + $0x100] sm:$0xff]  ;;  %p555_p4 = por %p554_p3, %p553_p2 }
  0x2c   :  { %407 = vmatpush3.msra.mxu1 %v67_v5  ;;  %v84_v20 = vld [vmem:[#allocation5 + $0xf8] sm:$0xff]  ;;  %438 = vmatpush3.msra.mxu0 %v85_v19  ;;  %v83_v21 = vld [vmem:[#allocation5 + $0xf0] sm:$0xff]  ;;  %v82_v22 = vld [vmem:[#allocation5 + $0xe8] sm:$0xff] }
  0x2d   :  { %408 = vmatprep.subr.mxu1 %v579_v0  ;;  %439 = vmatprep.subr.mxu0 %v579_v0  ;;  %v81_v23 = vld [vmem:[#allocation5 + $0xe0] sm:$0xff]  ;;  %v80_v24 = vld [vmem:[#allocation5 + $0xd8] sm:$0xff]  ;;  %v79_v25 = vld [vmem:[#allocation5 + $0xd0] sm:$0xff]  ;;  %p556_p5 = pnand %p555_p4, %p549_p1 }
  0x2e   :  { %409 = vmatpush3.msra.mxu1 %v66_v6  ;;  %440 = vmatpush3.msra.mxu0 %v84_v20  ;;  %v357_v26 = vld [vmem:[#allocation7] ss:$0 sm:$0xff]  ;;  %v77_v32 = vld [vmem:[#allocation5 + $0xc0] sm:$0xff]  ;;  %v76_v33 = vld [vmem:[#allocation5 + $0xb8] sm:$0xff] }
  0x2f   :  { %410 = vmatprep.subr.mxu1 %v579_v0  ;;  %441 = vmatprep.subr.mxu0 %v579_v0  ;;  %v78_v31 = vld [vmem:[#allocation5 + $0xc8] sm:$0xff]  ;;  %v75_v34 = vld [vmem:[#allocation5 + $0xb0] sm:$0xff]  ;;  %v73_v36 = vld [vmem:[#allocation5 + $0xa0] sm:$0xff] }
  0x30   :  { %411 = vmatpush3.msra.mxu1 %v65_v7  ;;  %442 = vmatpush3.msra.mxu0 %v83_v21  ;;  %v74_v35 = vld [vmem:[#allocation5 + $0xa8] sm:$0xff]  ;;  %v72_v37 = vld [vmem:[#allocation5 + $0x98] sm:$0xff]  ;;  %v71_v38 = vld [vmem:[#allocation5 + $0x90] sm:$0xff] }
  0x31   :  { %412 = vmatprep.subr.mxu1 %v579_v0  ;;  %443 = vmatprep.subr.mxu0 %v579_v0  ;;  %v70_v39 = vld [vmem:[#allocation5 + $0x88] sm:$0xff] }
  0x32   :  { %413 = vmatpush3.msra.mxu1 %v64_v8  ;;  %444 = vmatpush3.msra.mxu0 %v82_v22  ;;  %v359_v40 = vld [vmem:[#allocation7 + $0x1] ss:$0 sm:$0xff]  ;;  %v360_v47 = vld [vmem:[#allocation7 + $0x2] ss:$0 sm:$0xff] }
  0x33   :  { %414 = vmatprep.subr.mxu1 %v579_v0  ;;  %445 = vmatprep.subr.mxu0 %v579_v0 }
  0x34   :  { %415 = vmatpush3.msra.mxu1 %v63_v9  ;;  %446 = vmatpush3.msra.mxu0 %v81_v23 }
  0x35   :  { %416 = vmatprep.subr.mxu1 %v579_v0  ;;  %447 = vmatprep.subr.mxu0 %v579_v0 }
  0x36   :  { %417 = vmatpush3.msra.mxu1 %v62_v10  ;;  %448 = vmatpush3.msra.mxu0 %v80_v24 }
  0x37   :  { %418 = vmatprep.subr.mxu1 %v579_v0  ;;  %449 = vmatprep.subr.mxu0 %v579_v0 }
  0x38   :  { %419 = vmatpush3.msra.mxu1 %v61_v11  ;;  %450 = vmatpush3.msra.mxu0 %v79_v25 }
  0x39   :  { %420 = vmatprep.subr.mxu1 %v579_v0  ;;  %451 = vmatprep.subr.mxu0 %v579_v0 }
  0x3a   :  { %421 = vmatpush3.msra.mxu1 %v60_v12  ;;  %452 = vmatpush3.msra.mxu0 %v78_v31 }
  0x3b   :  { %422 = vmatprep.subr.mxu1 %v579_v0  ;;  %453 = vmatprep.subr.mxu0 %v579_v0 }
  0x3c   :  { %423 = vmatpush3.msra.mxu1 %v59_v13  ;;  %454 = vmatpush3.msra.mxu0 %v77_v32 }
  0x3d   :  { %424 = vmatprep.subr.mxu1 %v579_v0  ;;  %455 = vmatprep.subr.mxu0 %v579_v0 }
  0x3e   :  { %425 = vmatpush3.msra.mxu1 %v58_v14  ;;  %456 = vmatpush3.msra.mxu0 %v76_v33 }
  0x3f   :  { %426 = vmatprep.subr.mxu1 %v579_v0  ;;  %457 = vmatprep.subr.mxu0 %v579_v0 }
  0x40   :  { %427 = vmatpush3.msra.mxu1 %v57_v15  ;;  %458 = vmatpush3.msra.mxu0 %v75_v34 }
  0x41   :  { %428 = vmatprep.subr.mxu1 %v579_v0  ;;  %459 = vmatprep.subr.mxu0 %v579_v0 }
  0x42   :  { %429 = vmatpush3.msra.mxu1 %v56_v16  ;;  %460 = vmatpush3.msra.mxu0 %v74_v35 }
  0x43   :  { %430 = vmatprep.subr.mxu1 %v579_v0  ;;  %461 = vmatprep.subr.mxu0 %v579_v0 }
  0x44   :  { %431 = vmatpush3.msra.mxu1 %v55_v17  ;;  %462 = vmatpush3.msra.mxu0 %v73_v36 }
  0x45   :  { %432 = vmatprep.subr.mxu1 %v579_v0  ;;  %463 = vmatprep.subr.mxu0 %v579_v0 }
  0x46   :  { %433 = vmatpush3.msra.mxu1 %v54_v18  ;;  %464 = vmatpush3.msra.mxu0 %v72_v37 }
  0x47   :  { %465 = vmatprep.subr.mxu0 %v579_v0 }
  0x48   :  { %466 = vmatpush3.msra.mxu0 %v71_v38 }
  0x49   :  { %467 = vmatprep.subr.mxu0 %v579_v0 }
  0x4a   :  { %468 = vmatpush3.msra.mxu0 %v70_v39 }
  0xe9   :  { %v163_v27 = vpop.f32.mrf.mxu0 }
  0xea   :  { %v164_v28 = vadd.f32 %v357_v26, %v163_v27 }
  0xeb   :  { %v401_v29 = vpop.f32.mrf.mxu0 }
  0xec   :  { %480 = vtanh.f32 %v164_v28 }
  0xf9   :  { %v481_v30 = vpop.eup %480 }
  0xfa   :  { %435 = vmatmul.mubr.f32.vlgmr.msra.gmra.mxu1 %v481_v30 }
 0x1ba   :  { %v238_v41 = vpop.f32.mrf.mxu1 }
 0x1bb   :  { %v239_v42 = vadd.f32 %v359_v40, %v238_v41 }
 0x1bc   :  { %v436_v43 = vpop.f32.mrf.mxu1 }
 0x1bd   :  { %482 = vtanh.f32 %v239_v42 }
 0x1ca   :  { %v483_v44 = vpop.eup %482 }
 0x1cb   :  { %470 = vmatmul.mubr.f32.vlgmr.msra.gmra.mxu0 %v483_v44 }
 0x28b   :  { %v313_v48 = vpop.f32.mrf.mxu0 }
 0x28c   :  { %v314_v49 = vadd.f32 %v360_v47, %v313_v48 }
 0x28d   :  { %v471_v50 = vpop.f32.mrf.mxu0 }
 0x28e   :  { %v338_v51 = vsel %vm320_vm2, %v314_v49, 0.0  ;;  %v323_v52 = vsel %vm319_vm3, %v314_v49, -1e+30 }
 0x28f   :  { %v324_v53 = vsel %vm93_vm1, %v323_v52, -inf }
 0x290   :  { %325 = vmax.xlane.f32.xlu0 %v324_v53 }
 0x319   :  { %v326_v54 = vpop.xlane.xlu0 %325 }
 0x31a   :  { %v327_v55 = vsub.f32 %v323_v52, %v326_v54 }
 0x31c   :  { %v328_v56 = vmul.f32 1.442695, %v327_v55 }
 0x31e   :  { %484 = vpow2.f32 %v328_v56 }
 0x32b   :  { %v485_v57 = vpop.eup %484 }
 0x32c   :  { %v330_v58 = vsel %vm319_vm3, %v485_v57, 0.0 }
 0x32d   :  { %v331_v59 = vsel %vm93_vm1, %v330_v58, 0.0 }
 0x32e   :  { %332 = vadd.xlane.f32.xlu0 %v331_v59 }
 0x3b7   :  { %v333_v60 = vpop.xlane.xlu0 %332 }
 0x3b8   :  { %486 = vrcp.f32 %v333_v60 }
 0x3c5   :  { %v487_v61 = vpop.eup %486 }
 0x3c6   :  { %v335_v62 = vmul.f32 %v487_v61, %v330_v58 }
 0x3c8   :  { %v339_v63 = vsel %vm319_vm3, %v335_v62, %v338_v51 }
 0x3c9   :  { %340 = vst.msk [vmem:[#allocation8] sm:$0xff] %vm93_vm1, %v339_v63 }
 0x3ca   :  { %559 = shalt.err (!%p556_p5)
}
 0x3cb   :  { %350 = dma.vmem_to_hbm [thread:$0]  %s348_s2, 128, %s663_s3, [#allocation4]  }
 0x3cc   :  { %572 = dma.done.wait [#allocation4], 128  }
 0x3cd   :  { %573 = vsyncadd [#allocation4], 4294967168 }
 0x3ce   :  { %354 = vsyncpa [#allocation3], 1 }
 0x3cf   :  { %355 = vsyncpa [#allocation6], 1 }
 0x3d0   :  { %356 = vsyncpa [#allocation4], 1 }

</bundles_post_ra>
